<compile_context>
chip_gen: v6e
topology: v6e:2x2x1
jax: 0.10.0
libtpu: 0.0.40
codegen_flags: <defaults>
</compile_context>

<pallas_src>
import functools
import math

import jax
import jax.numpy as jnp
from jax.experimental import pallas as pl
from jax.experimental.pallas import tpu as pltpu


def _round_up(x, m):
    return ((x + m - 1) // m) * m


# ----------------------------------------------------------------------------
# Kernel 1: fused dense  y = act(x @ W + b)
# ----------------------------------------------------------------------------
def _dense_kernel(x_ref, w_ref, b_ref, o_ref, *, activation):
    acc = jnp.dot(x_ref[...], w_ref[...], preferred_element_type=jnp.float32)
    acc = acc + b_ref[...]
    if activation == "relu":
        acc = jnp.maximum(acc, 0.0)
    o_ref[...] = acc.astype(o_ref.dtype)


def dense(x, w, b, *, activation=None, tm=512):
    """x: (..., d_in), w: (d_in, d_out), b: (d_out,) -> (..., d_out)."""
    lead = x.shape[:-1]
    d_in, d_out = w.shape
    rows = math.prod(lead)
    x2 = x.reshape(rows, d_in)

    tile = min(tm, _round_up(rows, 8))
    rows_p = _round_up(rows, tile)
    if rows_p != rows:
        x2 = jnp.pad(x2, ((0, rows_p - rows), (0, 0)))

    out = pl.pallas_call(
        functools.partial(_dense_kernel, activation=activation),
        out_shape=jax.ShapeDtypeStruct((rows_p, d_out), x.dtype),
        grid_spec=pltpu.PrefetchScalarGridSpec(
            num_scalar_prefetch=0,
            grid=(rows_p // tile,),
            in_specs=[
                pl.BlockSpec((tile, d_in), lambda i: (i, 0)),
                pl.BlockSpec((d_in, d_out), lambda i: (0, 0)),
                pl.BlockSpec((1, d_out), lambda i: (0, 0)),
            ],
            out_specs=pl.BlockSpec((tile, d_out), lambda i: (i, 0)),
        ),
        compiler_params=pltpu.CompilerParams(
            dimension_semantics=("parallel",)),
    )(x2, w, b.reshape(1, d_out))
    return out[:rows].reshape(*lead, d_out)


# ----------------------------------------------------------------------------
# Kernel 2: multi-head scaled-dot-product attention (one batch per grid step)
# ----------------------------------------------------------------------------
def _mha_kernel(q_ref, k_ref, v_ref, mask_ref, o_ref, *, scale):
    q = q_ref[0]          # (H, Sq, depth)
    k = k_ref[0]          # (H, Sk, depth)
    v = v_ref[0]          # (H, Sk, depth)
    logits = jnp.einsum("hqd,hkd->hqk", q, k,
                        preferred_element_type=jnp.float32) * scale
    logits = logits + mask_ref[0][None, :, :] * (-1e9)
    m = jnp.max(logits, axis=-1, keepdims=True)
    p = jnp.exp(logits - m)
    attn = p / jnp.sum(p, axis=-1, keepdims=True)
    out = jnp.einsum("hqk,hkd->hqd", attn.astype(v.dtype), v,
                     preferred_element_type=jnp.float32)
    o_ref[0] = out.astype(o_ref.dtype)


def multi_head_attention(x_q, x_k, x_v, mask, p, num_heads):
    """Equivalent of MultiHeadAttention.forward(v, k, q, mask) (q/k/v order here)."""
    B, S_q, d_model = x_q.shape
    S_k = x_k.shape[1]
    depth = d_model // num_heads

    q = dense(x_q, p["wq_w"], p["wq_b"])
    k = dense(x_k, p["wk_w"], p["wk_b"])
    v = dense(x_v, p["wv_w"], p["wv_b"])

    def split_heads(t, s):
        return jnp.transpose(t.reshape(B, s, num_heads, depth), (0, 2, 1, 3))

    qh, kh, vh = split_heads(q, S_q), split_heads(k, S_k), split_heads(v, S_k)
    # mask: (B,1,1,Sk) or (B,1,Sq,Sk)  ->  (B,Sq,Sk); head-invariant
    mask3 = jnp.broadcast_to(mask[:, 0], (B, S_q, S_k)).astype(jnp.float32)

    attn = pl.pallas_call(
        functools.partial(_mha_kernel, scale=1.0 / math.sqrt(depth)),
        out_shape=jax.ShapeDtypeStruct((B, num_heads, S_q, depth), x_q.dtype),
        grid_spec=pltpu.PrefetchScalarGridSpec(
            num_scalar_prefetch=0,
            grid=(B,),
            in_specs=[
                pl.BlockSpec((1, num_heads, S_q, depth), lambda b: (b, 0, 0, 0)),
                pl.BlockSpec((1, num_heads, S_k, depth), lambda b: (b, 0, 0, 0)),
                pl.BlockSpec((1, num_heads, S_k, depth), lambda b: (b, 0, 0, 0)),
                pl.BlockSpec((1, S_q, S_k), lambda b: (b, 0, 0)),
            ],
            out_specs=pl.BlockSpec((1, num_heads, S_q, depth),
                                   lambda b: (b, 0, 0, 0)),
        ),
        compiler_params=pltpu.CompilerParams(
            dimension_semantics=("parallel",)),
    )(qh, kh, vh, mask3)

    merged = jnp.transpose(attn, (0, 2, 1, 3)).reshape(B, S_q, d_model)
    return dense(merged, p["dense_w"], p["dense_b"])


# ----------------------------------------------------------------------------
# Kernel 3: fused residual-add + LayerNorm (eps inside sqrt, biased variance)
# ----------------------------------------------------------------------------
def _add_ln_kernel(x_ref, r_ref, g_ref, b_ref, o_ref, *, eps):
    s = x_ref[...].astype(jnp.float32) + r_ref[...].astype(jnp.float32)
    mu = jnp.mean(s, axis=-1, keepdims=True)
    c = s - mu
    var = jnp.mean(c * c, axis=-1, keepdims=True)
    y = c * jax.lax.rsqrt(var + eps) * g_ref[...] + b_ref[...]
    o_ref[...] = y.astype(o_ref.dtype)


def add_layernorm(x, residual, gamma, beta, *, eps=1e-6, tm=512):
    B, S, D = x.shape
    rows = B * S
    tile = min(tm, _round_up(rows, 8))
    rows_p = _round_up(rows, tile)
    x2 = x.reshape(rows, D)
    r2 = residual.reshape(rows, D)
    if rows_p != rows:
        x2 = jnp.pad(x2, ((0, rows_p - rows), (0, 0)))
        r2 = jnp.pad(r2, ((0, rows_p - rows), (0, 0)))

    out = pl.pallas_call(
        functools.partial(_add_ln_kernel, eps=eps),
        out_shape=jax.ShapeDtypeStruct((rows_p, D), x.dtype),
        grid_spec=pltpu.PrefetchScalarGridSpec(
            num_scalar_prefetch=0,
            grid=(rows_p // tile,),
            in_specs=[
                pl.BlockSpec((tile, D), lambda i: (i, 0)),
                pl.BlockSpec((tile, D), lambda i: (i, 0)),
                pl.BlockSpec((1, D), lambda i: (0, 0)),
                pl.BlockSpec((1, D), lambda i: (0, 0)),
            ],
            out_specs=pl.BlockSpec((tile, D), lambda i: (i, 0)),
        ),
        compiler_params=pltpu.CompilerParams(
            dimension_semantics=("parallel",)),
    )(x2, r2, gamma.reshape(1, D), beta.reshape(1, D))
    return out[:rows].reshape(B, S, D)


# ----------------------------------------------------------------------------
# Module-level composition (dropout == identity: inference mode)
# ----------------------------------------------------------------------------
def feed_forward(x, p):
    h = dense(x, p["fc1_w"], p["fc1_b"], activation="relu")
    return dense(h, p["fc2_w"], p["fc2_b"])


def encoder_layer(x, mask, p, num_heads):
    attn = multi_head_attention(x, x, x, mask, p["mha"], num_heads)
    out1 = add_layernorm(attn, x, p["ln1_g"], p["ln1_b"])
    ffn_out = feed_forward(out1, p["ffn"])
    return add_layernorm(ffn_out, out1, p["ln2_g"], p["ln2_b"])


def decoder_layer(x, enc_out, look_ahead_mask, padding_mask, p, num_heads):
    attn1 = multi_head_attention(x, x, x, look_ahead_mask, p["mha1"], num_heads)
    out1 = add_layernorm(attn1, x, p["ln1_g"], p["ln1_b"])
    attn2 = multi_head_attention(out1, enc_out, enc_out, padding_mask,
                                 p["mha2"], num_heads)
    out2 = add_layernorm(attn2, out1, p["ln2_g"], p["ln2_b"])
    ffn_out = feed_forward(out2, p["ffn"])
    return add_layernorm(ffn_out, out2, p["ln3_g"], p["ln3_b"])


# Masks (cheap host-side glue, matches Transformer.create_masks intent).
# TODO(synk): the reference builds masks with torch.eq(token_ids, 0) while the
# encoder consumes embeddings; here a position is padding iff its whole
# embedding vector equals the pad value 0, which keeps broadcastable shapes.
def create_padding_mask(x_emb):
    is_pad = jnp.all(x_emb == 0.0, axis=-1).astype(jnp.float32)   # (B, S)
    return is_pad[:, None, None, :]                                # (B,1,1,S)


def create_look_ahead_mask(size):
    return 1.0 - jnp.tril(jnp.ones((size, size), jnp.float32))     # (S, S)


def create_masks(inp, tar):
    enc_padding_mask = create_padding_mask(inp)
    dec_padding_mask = create_padding_mask(inp)
    dec_inp_padding_mask = create_padding_mask(tar)
    look_ahead = create_look_ahead_mask(tar.shape[1])[None, None]  # (1,1,S,S)
    combined_mask = jnp.maximum(dec_inp_padding_mask, look_ahead)  # (B,1,S,S)
    return enc_padding_mask, combined_mask, dec_padding_mask


def transformer_forward(inp, tar, params, num_heads):
    enc_pad, combined, dec_pad = create_masks(inp, tar)
    enc_out = encoder_layer(inp, enc_pad, params["enc"], num_heads)
    dec_out = decoder_layer(tar, enc_out, combined, dec_pad,
                            params["dec"], num_heads)
    return dense(dec_out, params["final_w"], params["final_b"])


# ----------------------------------------------------------------------------
# Parameter init (PyTorch Linear default: U(-1/sqrt(fan_in), 1/sqrt(fan_in)))
# ----------------------------------------------------------------------------
def _init_linear(key, d_in, d_out):
    kw, kb = jax.random.split(key)
    bound = 1.0 / math.sqrt(d_in)
    w = jax.random.uniform(kw, (d_in, d_out), jnp.float32, -bound, bound)
    b = jax.random.uniform(kb, (d_out,), jnp.float32, -bound, bound)
    return w, b


def _init_mha(key, d_model):
    p = {}
    for name, k in zip(("wq", "wk", "wv", "dense"), jax.random.split(key, 4)):
        w, b = _init_linear(k, d_model, d_model)
        p[name + "_w"], p[name + "_b"] = w, b
    return p


def _init_ffn(key, d_model, dff):
    k1, k2 = jax.random.split(key)
    p = {}
    p["fc1_w"], p["fc1_b"] = _init_linear(k1, d_model, dff)
    p["fc2_w"], p["fc2_b"] = _init_linear(k2, dff, d_model)
    return p


def init_transformer_params(key, d_model, num_heads, dff, target_vocab):
    k_enc, k_dec, k_fin = jax.random.split(key, 3)
    ke1, ke2 = jax.random.split(k_enc)
    enc = {
        "mha": _init_mha(ke1, d_model),
        "ffn": _init_ffn(ke2, d_model, dff),
        "ln1_g": jnp.ones((d_model,), jnp.float32),
        "ln1_b": jnp.zeros((d_model,), jnp.float32),
        "ln2_g": jnp.ones((d_model,), jnp.float32),
        "ln2_b": jnp.zeros((d_model,), jnp.float32),
    }
    kd1, kd2, kd3 = jax.random.split(k_dec, 3)
    dec = {
        "mha1": _init_mha(kd1, d_model),
        "mha2": _init_mha(kd2, d_model),
        "ffn": _init_ffn(kd3, d_model, dff),
        "ln1_g": jnp.ones((d_model,), jnp.float32),
        "ln1_b": jnp.zeros((d_model,), jnp.float32),
        "ln2_g": jnp.ones((d_model,), jnp.float32),
        "ln2_b": jnp.zeros((d_model,), jnp.float32),
        "ln3_g": jnp.ones((d_model,), jnp.float32),
        "ln3_b": jnp.zeros((d_model,), jnp.float32),
    }
    fw, fb = _init_linear(k_fin, d_model, target_vocab)
    return {"enc": enc, "dec": dec, "final_w": fw, "final_b": fb}


# ----------------------------------------------------------------------------
# Pure-JAX reference (same math, no Pallas)
# ----------------------------------------------------------------------------
def ref_forward(inp, tar, params, num_heads):
    def lin(x, w, b):
        return jnp.dot(x, w) + b

    def softmax(z):
        m = jnp.max(z, axis=-1, keepdims=True)
        e = jnp.exp(z - m)
        return e / jnp.sum(e, axis=-1, keepdims=True)

    def mha(x_q, x_k, x_v, mask, p):
        B, Sq, D = x_q.shape
        Sk = x_k.shape[1]
        depth = D // num_heads

        def split(t, s):
            return jnp.transpose(t.reshape(B, s, num_heads, depth), (0, 2, 1, 3))

        q = split(lin(x_q, p["wq_w"], p["wq_b"]), Sq)
        k = split(lin(x_k, p["wk_w"], p["wk_b"]), Sk)
        v = split(lin(x_v, p["wv_w"], p["wv_b"]), Sk)
        logits = jnp.einsum("bhqd,bhkd->bhqk", q, k) / math.sqrt(depth)
        logits = logits + mask * (-1e9)
        w_ = softmax(logits)
        o = jnp.einsum("bhqk,bhkd->bhqd", w_, v)
        o = jnp.transpose(o, (0, 2, 1, 3)).reshape(B, Sq, D)
        return lin(o, p["dense_w"], p["dense_b"])

    def layernorm(x, g, b, eps=1e-6):
        mu = jnp.mean(x, axis=-1, keepdims=True)
        var = jnp.mean((x - mu) ** 2, axis=-1, keepdims=True)
        return (x - mu) * jax.lax.rsqrt(var + eps) * g + b

    def ffn(x, p):
        return lin(jnp.maximum(lin(x, p["fc1_w"], p["fc1_b"]), 0.0),
                   p["fc2_w"], p["fc2_b"])

    enc_pad, combined, dec_pad = create_masks(inp, tar)

    pe = params["enc"]
    a = mha(inp, inp, inp, enc_pad, pe["mha"])
    o1 = layernorm(inp + a, pe["ln1_g"], pe["ln1_b"])
    enc_out = layernorm(o1 + ffn(o1, pe["ffn"]), pe["ln2_g"], pe["ln2_b"])

    pd = params["dec"]
    a1 = mha(tar, tar, tar, combined, pd["mha1"])
    d1 = layernorm(tar + a1, pd["ln1_g"], pd["ln1_b"])
    a2 = mha(d1, enc_out, enc_out, dec_pad, pd["mha2"])
    d2 = layernorm(d1 + a2, pd["ln2_g"], pd["ln2_b"])
    d3 = layernorm(d2 + ffn(d2, pd["ffn"]), pd["ln3_g"], pd["ln3_b"])

    return lin(d3, params["final_w"], params["final_b"])


if __name__ == "__main__":
    B, S_IN, S_TAR = 2, 8, 8
    D_MODEL, NUM_HEADS, DFF, TARGET_VOCAB = 32, 4, 64, 128

    key = jax.random.PRNGKey(0)
    k_inp, k_tar, k_par = jax.random.split(key, 3)

    # inputs are embedded sequences (B, S, d_model), as the Linear layers in
    # the encoder/decoder consume them directly
    inp = jax.random.normal(k_inp, (B, S_IN, D_MODEL), jnp.float32)
    tar = jax.random.normal(k_tar, (B, S_TAR, D_MODEL), jnp.float32)
    # make the last two source positions "padding" so the padding masks are
    # actually exercised
    inp = inp.at[:, -2:, :].set(0.0)

    params = init_transformer_params(k_par, D_MODEL, NUM_HEADS, DFF,
                                     TARGET_VOCAB)

    out = transformer_forward(inp, tar, params, NUM_HEADS)
    out = jax.block_until_ready(out)

    ref = ref_forward(inp, tar, params, NUM_HEADS)

    assert out.shape == (B, S_TAR, TARGET_VOCAB)
    assert jnp.allclose(out, ref, atol=1e-4, rtol=1e-4), float(
        jnp.max(jnp.abs(out - ref)))
    print("KERNEL_OK")
</pallas_src>

<mosaic_0001>
module attributes {stable_mosaic.version = 11 : i64} {
  func.func @_dense_kernel(%arg0: i32, %arg1: memref<16x32xf32, #tpu.memory_space<vmem>>, %arg2: memref<32x32xf32, #tpu.memory_space<vmem>>, %arg3: memref<1x32xf32, #tpu.memory_space<vmem>>, %arg4: memref<16x32xf32, #tpu.memory_space<vmem>>) attributes {dimension_semantics = [#tpu.dimension_semantics<parallel>], iteration_bounds = array<i64: 1>, scalar_prefetch = 0 : i64, scratch_operands = 0 : i64, tpu.core_type = #tpu.core_type<tc>, window_params = [{transform_indices = @transform_0, window_bounds = array<i64: 16, 32>}, {pipeline_mode = #tpu.pipeline_mode<synchronous>, transform_indices = @transform_1, window_bounds = array<i64: 32, 32>}, {pipeline_mode = #tpu.pipeline_mode<synchronous>, transform_indices = @transform_2, window_bounds = array<i64: 1, 32>}, {transform_indices = @transform_3, window_bounds = array<i64: 16, 32>}]} {
    %c0 = arith.constant 0 : index
    %c0_0 = arith.constant 0 : index
    %0 = vector.load %arg1[%c0, %c0_0] : memref<16x32xf32, #tpu.memory_space<vmem>>, vector<16x32xf32>
    %c0_1 = arith.constant 0 : index
    %c0_2 = arith.constant 0 : index
    %1 = vector.load %arg2[%c0_1, %c0_2] : memref<32x32xf32, #tpu.memory_space<vmem>>, vector<32x32xf32>
    %cst = arith.constant dense<0.000000e+00> : vector<16x32xf32>
    %2 = tpu.matmul %0, %1, %cst {dimension_numbers = #tpu.dot_dimension_numbers<[1], [0], [0], [1], [0, 0, 1, 1], [], []>} : vector<16x32xf32>, vector<32x32xf32>, vector<16x32xf32> -> vector<16x32xf32>
    %c0_3 = arith.constant 0 : index
    %c0_4 = arith.constant 0 : index
    %3 = vector.load %arg3[%c0_3, %c0_4] : memref<1x32xf32, #tpu.memory_space<vmem>>, vector<1x32xf32>
    %4 = vector.broadcast %3 : vector<1x32xf32> to vector<16x32xf32>
    %5 = arith.addf %2, %4 : vector<16x32xf32>
    %c0_5 = arith.constant 0 : index
    %c0_6 = arith.constant 0 : index
    %6 = vector.load %arg4[%c0_5, %c0_6] : memref<16x32xf32, #tpu.memory_space<vmem>>, vector<16x32xf32>
    tpu.vector_store %arg4[%c0_5, %c0_6], %5 {strides = array<i32>} : memref<16x32xf32, #tpu.memory_space<vmem>>, vector<16x32xf32>,
    return
  }
  func.func @transform_0(%arg0: i32) -> (i32, i32) {
    %c0_i32 = arith.constant 0 : i32
    %c0_i32_0 = arith.constant 0 : i32
    return %arg0, %c0_i32 : i32, i32
  }
  func.func @transform_1(%arg0: i32) -> (i32, i32) {
    %c0_i32 = arith.constant 0 : i32
    %c0_i32_0 = arith.constant 0 : i32
    %c0_i32_1 = arith.constant 0 : i32
    return %c0_i32, %c0_i32_0 : i32, i32
  }
  func.func @transform_2(%arg0: i32) -> (i32, i32) {
    %c0_i32 = arith.constant 0 : i32
    %c0_i32_0 = arith.constant 0 : i32
    %c0_i32_1 = arith.constant 0 : i32
    return %c0_i32, %c0_i32_0 : i32, i32
  }
  func.func @transform_3(%arg0: i32) -> (i32, i32) {
    %c0_i32 = arith.constant 0 : i32
    %c0_i32_0 = arith.constant 0 : i32
    return %arg0, %c0_i32 : i32, i32
  }
}

</mosaic_0001>

<bundles_post_ra>
// kernel: tpu_custom_call.1
= control target key start
LH: loop header
LB: loop body
LE: loop exit
PB: predicated region body
PF: predicated region fallthrough
CT: control target
= control target key end

     0   :  { %8 = vsyncpa [#allocation3], 0  ;;  %s299_s0 = inlined_call_operand.hbm [shape: f32[16,32], index: 0, kind: input, shape index: {}]   ;;  %s300_s1 = inlined_call_operand.hbm [shape: f32[32,32], index: 1, kind: input, shape index: {}]   ;;  %s301_s2 = inlined_call_operand.vmem [shape: f32[1,32], index: 2, kind: input, shape index: {}]   ;;  %s302_s3 = inlined_call_operand.hbm [shape: f32[16,32], index: 3, kind: output, shape index: {}]  }
   0x1   :  { %9 = vsyncpa [#allocation6], 0 }
   0x2   :  { %10 = vsyncpa [#allocation4], 0  ;;  %s249_s12 = smov [#allocation2]  }
   0x3   :  { %s16_s13 = sshll.u32 %s249_s12, 4  ;;  %s17_s13 = int_to_ptr.vmem [resolvable:$true] %s16_s13 }
   0x4   :  { %s191_s14 = scalar_lea.vmem %s17_s13, 256  ;;  %p196_p1 = scmp.lt.s32.totalorder %s17_s13, %s17_s13 }
   0x5   :  { %p192_p0 = scmp.ne.s32.totalorder %s17_s13, %s191_s14  ;;  %p197_p2 = scmp.lt.s32.totalorder %s191_s14, %s191_s14 }
   0x7   :  { %p198_p3 = por %p197_p2, %p196_p1 }
   0x9   :  { %p199_p4 = pnand %p198_p3, %p192_p0 }
   0xb   :  { %202 = shalt.err (!%p199_p4)
}
   0xc   :  { %s250_s15 = smov 128   ;;  %s251_s16 = smov 8  }
   0xd   :  { %22 = dma.hbm_to_vmem [thread:$0]  %s299_s0, 256, %s17_s13, [#allocation3], %s250_s15, %s250_s15, %s251_s16  }
   0xe   :  { %s252_s19 = smov [#allocation5]  }
   0xf   :  { %s28_s20 = sshll.u32 %s252_s19, 4  ;;  %s29_s20 = int_to_ptr.vmem [resolvable:$true] %s28_s20 }
  0x10   :  { %s211_s21 = scalar_lea.vmem %s29_s20, 512  ;;  %p216_p6 = scmp.lt.s32.totalorder %s29_s20, %s29_s20 }
  0x11   :  { %p212_p5 = scmp.ne.s32.totalorder %s29_s20, %s211_s21  ;;  %p217_p7 = scmp.lt.s32.totalorder %s211_s21, %s211_s21 }
  0x13   :  { %p218_p8 = por %p217_p7, %p216_p6 }
  0x15   :  { %p219_p9 = pnand %p218_p8, %p212_p5 }
  0x17   :  { %222 = shalt.err (!%p219_p9)
}
  0x18   :  { %34 = dma.hbm_to_vmem [thread:$0]  %s300_s1, 512, %s29_s20, [#allocation6], %s250_s15, %s250_s15, %s251_s16  }
  0x19   :  { %243 = dma.done.wait [#allocation3], 256  }
  0x1a   :  { %244 = vsyncadd [#allocation3], 4294967040 }
  0x1b   :  { %245 = dma.done.wait [#allocation6], 512  }
  0x1c   :  { %246 = vsyncadd [#allocation6], 4294966784  ;;  %vm56_vm0 = vcmask 261120   ;;  %v48_v0 = vld [vmem:[#allocation5 + $0x18] sm:$0xff]  ;;  %v47_v1 = vld [vmem:[#allocation5 + $0x10] sm:$0xff]  ;;  %s253_s24 = smov [#allocation7]  }
  0x1d   :  { %167 = vmatprep.subr.mxu0 %v48_v0  ;;  %v43_v2 = vld [vmem:[#allocation2] sm:$0xff]  ;;  %v46_v3 = vld [vmem:[#allocation5 + $0x8] sm:$0xff]  ;;  %v45_v4 = vld [vmem:[#allocation5] sm:$0xff]  ;;  %s145_s25 = sshll.u32 %s253_s24, 4  ;;  %s146_s25 = int_to_ptr.vmem [resolvable:$true] %s145_s25 }
  0x1e   :  { %168 = vmatpush3.msra.mxu0 %v48_v0  ;;  %175 = vmatprep.mubr.msk.f32.mxu0 %vm56_vm0, %v43_v2  ;;  %v44_v5 = vld [vmem:[#allocation2 + $0x8] sm:$0xff]  ;;  %v158_v6 = vld [vmem:[%s301_s2] ss:$0 sm:$0xff]  ;;  %s223_s26 = scalar_lea.vmem %s146_s25, 256  ;;  %p228_p11 = scmp.lt.s32.totalorder %s146_s25, %s146_s25 }
  0x1f   :  { %169 = vmatprep.subr.mxu0 %v47_v1  ;;  %p224_p10 = scmp.ne.s32.totalorder %s146_s25, %s223_s26  ;;  %p229_p12 = scmp.lt.s32.totalorder %s223_s26, %s223_s26 }
  0x20   :  { %170 = vmatpush3.msra.mxu0 %v47_v1 }
  0x21   :  { %171 = vmatprep.subr.mxu0 %v46_v3  ;;  %p230_p13 = por %p229_p12, %p228_p11 }
  0x22   :  { %172 = vmatpush3.msra.mxu0 %v46_v3 }
  0x23   :  { %173 = vmatprep.subr.mxu0 %v45_v4  ;;  %p231_p0 = pnand %p230_p13, %p224_p10 }
  0x24   :  { %174 = vmatpush3.msra.mxu0 %v45_v4 }
  0x25   :  { %176 = vmatmul.mubr.msk.f32.vlgmr.msra.gmra.mxu0 %vm56_vm0, %v44_v5 }
  0xe5   :  { %v177_v7 = vpop.f32.mrf.mxu0 }
  0xe6   :  { %v135_v8 = vadd.f32 %v177_v7, %v158_v6 }
  0xe7   :  { %v129_v9 = vpop.f32.mrf.mxu0 }
  0xe8   :  { %139 = vst.msk [vmem:[#allocation7 + $0x8] sm:$0xff] %vm56_vm0, %v135_v8  ;;  %v130_v10 = vadd.f32 %v158_v6, %v129_v9 }
  0xea   :  { %138 = vst.msk [vmem:[#allocation7] sm:$0xff] %vm56_vm0, %v130_v10 }
  0xeb   :  { %234 = shalt.err (!%p231_p0)
}
  0xec   :  { %151 = dma.vmem_to_hbm [thread:$0]  %s146_s25, 256, %s302_s3, [#allocation4], %s250_s15, %s250_s15, %s251_s16  }
  0xed   :  { %247 = dma.done.wait [#allocation4], 256  }
  0xee   :  { %248 = vsyncadd [#allocation4], 4294967040 }
  0xef   :  { %155 = vsyncpa [#allocation3], 1 }
  0xf0   :  { %156 = vsyncpa [#allocation6], 1 }
  0xf1   :  { %157 = vsyncpa [#allocation4], 1 }

</bundles_post_ra>
